<compile_context>
chip_gen: v7x
topology: tpu7x:2x2x1
jax: 0.10.0
libtpu: 0.0.40
codegen_flags: <defaults>
</compile_context>

<pallas_src>
import jax
import jax.numpy as jnp
from jax.experimental import pallas as pl
from jax.experimental.pallas import tpu as pltpu

EPS = 1e-5
RG = 128  # rnn_size / feature slabs lane-padded to one full vreg lane group


def _bn_fused(h, gamma, beta):
    # training-mode BN over the node (batch) axis, biased variance.
    # One-pass form: the two axis-0 reductions (mean(h), mean(h*h)) are
    # independent, shortening the XLU reduce chain on the critical path.
    mean = jnp.mean(h, axis=0, keepdims=True)
    var = jnp.mean(h * h, axis=0, keepdims=True) - mean * mean
    return (h - mean) * jax.lax.rsqrt(var + EPS) * gamma + beta


def node_rnn_1_step_kernel(
    row_ref,        # (1, 1, E) int32 -- edge_index[0] for this step
    x_ref,          # (1, N, Fx)
    ea_ref,         # (1, E, Fe)
    h0_ref,         # (N, R)          -- initial hidden, consumed at t == 0 only
    w1_ref,         # (RG, H)         -- Linear1 weight, rows 0:Fx+Fe valid
    w2_ref,         # (H, H)
    wgi_ref,        # (H, 4*RG)       -- fused GRU input weights (gate blocks)
    wgh_ref,        # (RG, 4*RG)      -- fused GRU hidden weights, rows 0:R valid
    bias_ref,       # (8, 4*RG)       -- b1,g1,be1,b2,g2,be2 (cols 0:H), row6 = GRU bias
    out_ref,        # (1, N, RG)      -- lane-padded hn for this step (valid cols 0:R)
    hstate_ref,     # (N, RG) VMEM    -- hidden-state carry across grid steps
    feat_ref,       # (N, RG) VMEM    -- [x | agg] staging slab
):
    t = pl.program_id(0)
    N = x_ref.shape[1]
    E = ea_ref.shape[1]
    Fx = x_ref.shape[2]
    Fe = ea_ref.shape[2]
    H = w2_ref.shape[0]
    R = h0_ref.shape[1]

    @pl.when(t == 0)
    def _():
        # lane-pad the incoming h0 into the resident carry slab (pad lanes = 0)
        hstate_ref[...] = jnp.zeros_like(hstate_ref)
        hstate_ref[:, 0:R] = h0_ref[...]
        # feature staging slab: lanes >= Fx+Fe stay zero for the whole sequence
        feat_ref[...] = jnp.zeros_like(feat_ref)

    # ---- scatter_add(edge_attr, row, dim_size=N) as a one-hot matmul (MXU)
    row = row_ref[0]                                            # (1, E)
    node_ids = jax.lax.broadcasted_iota(jnp.int32, (N, E), 0)   # (N, E)
    onehot = (node_ids == row).astype(jnp.float32)              # (N, E)
    agg = jnp.dot(onehot, ea_ref[0], preferred_element_type=jnp.float32)

    # ---- node_mlp layer 1: single matmul on the lane-padded [x | agg] slab
    feat_ref[:, 0:Fx] = x_ref[0]
    feat_ref[:, Fx:Fx + Fe] = agg
    h = (jnp.dot(feat_ref[...], w1_ref[...], preferred_element_type=jnp.float32)
         + bias_ref[0:1, 0:H])
    h = jnp.maximum(h, 0.0)
    h = _bn_fused(h, bias_ref[1:2, 0:H], bias_ref[2:3, 0:H])

    # ---- node_mlp layer 2
    h = jnp.dot(h, w2_ref[...], preferred_element_type=jnp.float32) + bias_ref[3:4, 0:H]
    h = jnp.maximum(h, 0.0)
    h = _bn_fused(h, bias_ref[4:5, 0:H], bias_ref[5:6, 0:H])

    # ---- GRU cell: six gate matmuls fused into two lane-padded matmuls.
    # Lane layout of g (128-lane aligned gate blocks):
    #   [0:RG)      r pre-activation   (input + hidden, biases pre-summed)
    #   [RG:2RG)    z pre-activation   (input + hidden, biases pre-summed)
    #   [2RG:3RG)   W_in h + b_in
    #   [3RG:4RG)   W_hn h0 + b_hn
    h0p = hstate_ref[...]                                       # lane-padded h(t-1)
    g = (jnp.dot(h, wgi_ref[...], preferred_element_type=jnp.float32)
         + jnp.dot(h0p, wgh_ref[...], preferred_element_type=jnp.float32)
         + bias_ref[6:7, :])
    r = jax.nn.sigmoid(g[:, 0:RG])
    z = jax.nn.sigmoid(g[:, RG:2 * RG])
    n = jnp.tanh(g[:, 2 * RG:3 * RG] + r * g[:, 3 * RG:4 * RG])
    hn = (1.0 - z) * n + z * h0p                                # pad lanes stay exactly 0

    hstate_ref[...] = hn          # carry to next step (stays in VMEM)
    out_ref[0] = hn               # lane-dense unmasked (N,128) store


def pack_params(p, node_features=5, edge_features=3, hidden_size=64, rnn_size=20):
    """One-time packing of raw (PyTorch-style) params into kernel-friendly slabs."""
    H, R = hidden_size, rnn_size
    F = node_features + edge_features
    G = 4 * RG

    # Linear1 weight, zero-padded to a full 128-row contraction (one MXU pass)
    w1 = jnp.zeros((RG, H), jnp.float32).at[:F].set(p["w1"])

    wgi = jnp.zeros((H, G), jnp.float32)
    wgi = wgi.at[:, 0:R].set(p["wir"])
    wgi = wgi.at[:, RG:RG + R].set(p["wiz"])
    wgi = wgi.at[:, 2 * RG:2 * RG + R].set(p["win"])

    # hidden GRU weight takes the lane-padded h0 directly (rows R:RG are zero)
    wgh = jnp.zeros((RG, G), jnp.float32)
    wgh = wgh.at[0:R, 0:R].set(p["whr"])
    wgh = wgh.at[0:R, RG:RG + R].set(p["whz"])
    wgh = wgh.at[0:R, 3 * RG:3 * RG + R].set(p["whn"])

    bias = jnp.zeros((8, G), jnp.float32)
    bias = bias.at[0, 0:H].set(p["b1"][0])
    bias = bias.at[1, 0:H].set(p["g1"][0])
    bias = bias.at[2, 0:H].set(p["be1"][0])
    bias = bias.at[3, 0:H].set(p["b2"][0])
    bias = bias.at[4, 0:H].set(p["g2"][0])
    bias = bias.at[5, 0:H].set(p["be2"][0])
    bias = bias.at[6, 0:R].set(p["bir"][0] + p["bhr"][0])
    bias = bias.at[6, RG:RG + R].set(p["biz"][0] + p["bhz"][0])
    bias = bias.at[6, 2 * RG:2 * RG + R].set(p["bin"][0])
    bias = bias.at[6, 3 * RG:3 * RG + R].set(p["bhn"][0])

    return {"w1": w1, "w2": p["w2"], "wgi": wgi, "wgh": wgh, "bias": bias}


def _run_steps(packed, row_seq, x_seq, ea_seq, h0):
    """Run the fused cell over T steps in ONE pallas_call (grid=(T,)).

    row_seq: (T, E) int32, x_seq: (T, N, Fx), ea_seq: (T, E, Fe), h0: (N, R).
    Weight/bias slabs use constant index_maps -> DMA'd to VMEM once, resident
    for the whole grid; the hidden state is carried in a VMEM scratch.
    Returns the lane-padded per-step hidden states, shape (T, N, RG).
    """
    T, N, Fx = x_seq.shape
    E, Fe = ea_seq.shape[1], ea_seq.shape[2]
    H = packed["w2"].shape[0]
    R = h0.shape[1]
    G = packed["wgi"].shape[1]

    # advisory cost hint so XLA can schedule around this tiny custom call
    flops = 2 * T * N * (E * Fe + RG * H + H * H + H * G + RG * G)
    transcendentals = T * (3 * N * RG + 2 * H)
    bytes_accessed = 4 * (T * (E + N * Fx + E * Fe + N * RG) + N * R
                          + RG * H + H * H + H * G + RG * G + 8 * G)

    # TODO(synk): for large N*E (dense one-hot scatter) this single-block layout
    # should be tiled over node blocks and vmem_limit_bytes set explicitly
    # (v7x scoped VMEM is 32 MiB of 64 MiB physical).
    return pl.pallas_call(
        node_rnn_1_step_kernel,
        out_shape=jax.ShapeDtypeStruct((T, N, RG), jnp.float32),
        grid=(T,),
        in_specs=[
            pl.BlockSpec((1, 1, E), lambda t: (t, 0, 0)),    # row      (streams)
            pl.BlockSpec((1, N, Fx), lambda t: (t, 0, 0)),   # x        (streams)
            pl.BlockSpec((1, E, Fe), lambda t: (t, 0, 0)),   # edge_attr(streams)
            pl.BlockSpec((N, R), lambda t: (0, 0)),          # h0       (resident)
            pl.BlockSpec((RG, H), lambda t: (0, 0)),         # w1       (resident)
            pl.BlockSpec((H, H), lambda t: (0, 0)),          # w2       (resident)
            pl.BlockSpec((H, G), lambda t: (0, 0)),          # wgi      (resident)
            pl.BlockSpec((RG, G), lambda t: (0, 0)),         # wgh      (resident)
            pl.BlockSpec((8, G), lambda t: (0, 0)),          # bias slab(resident)
        ],
        out_specs=pl.BlockSpec((1, N, RG), lambda t: (t, 0, 0)),
        scratch_shapes=[
            pltpu.VMEM((N, RG), jnp.float32),   # hidden-state carry (lane-padded)
            pltpu.VMEM((N, RG), jnp.float32),   # [x | agg] staging slab
        ],
        compiler_params=pltpu.CompilerParams(
            dimension_semantics=("arbitrary",)),  # time axis carries state
        cost_estimate=pl.CostEstimate(flops=flops,
                                      transcendentals=transcendentals,
                                      bytes_accessed=bytes_accessed),
    )(row_seq.reshape(T, 1, E).astype(jnp.int32), x_seq, ea_seq, h0,
      packed["w1"], packed["w2"], packed["wgi"], packed["wgh"], packed["bias"])


def node_rnn_1_forward(packed, x, edge_index, edge_attr, u, batch, hidden):
    """Mirrors node_rnn_1.forward (one step).  Returns (out (N,R), hidden (1,N,R))."""
    del u, batch  # unused by the reference forward
    R = hidden.shape[-1]
    row_seq = edge_index[0].reshape(1, -1).astype(jnp.int32)     # (T=1, E)
    out_padded = _run_steps(packed, row_seq, x[None], edge_attr[None], hidden[0])
    out = out_padded[0, :, :R]    # out.squeeze() of the (N,1,R) GRU output
    return out, out[None]         # hidden shape (num_layers=1, N, R)


def node_rnn_1_forward_seq(packed, x_seq, edge_index_seq, edge_attr_seq, u, batch, hidden):
    """Steps the cell over T graph snapshots in ONE pallas_call (weights stay
    VMEM-resident; hidden state never leaves VMEM between steps).
    Returns (out (T,N,R), final hidden (1,N,R))."""
    del u, batch
    R = hidden.shape[-1]
    row_seq = edge_index_seq[:, 0, :].astype(jnp.int32)          # (T, E)
    out_padded = _run_steps(packed, row_seq, x_seq, edge_attr_seq, hidden[0])
    out = out_padded[:, :, :R]
    return out, out[-1][None]


def init_params(key, node_features=5, edge_features=3, hidden_size=64, rnn_size=20):
    """Deterministic synthetic raw parameters (PyTorch-style uniform init scales)."""
    f_in = node_features + edge_features
    ks = jax.random.split(key, 16)

    def u(k, shape, fan):
        b = 1.0 / jnp.sqrt(jnp.float32(fan))
        return jax.random.uniform(k, shape, jnp.float32, -b, b)

    p = {}
    p["w1"] = u(ks[0], (f_in, hidden_size), f_in)
    p["b1"] = u(ks[1], (1, hidden_size), f_in)
    p["g1"] = 1.0 + 0.1 * jax.random.normal(ks[2], (1, hidden_size), jnp.float32)
    p["be1"] = 0.1 * jax.random.normal(ks[3], (1, hidden_size), jnp.float32)
    p["w2"] = u(ks[4], (hidden_size, hidden_size), hidden_size)
    p["b2"] = u(ks[5], (1, hidden_size), hidden_size)
    p["g2"] = 1.0 + 0.1 * jax.random.normal(ks[6], (1, hidden_size), jnp.float32)
    p["be2"] = 0.1 * jax.random.normal(ks[7], (1, hidden_size), jnp.float32)
    p["wir"] = u(ks[8], (hidden_size, rnn_size), rnn_size)
    p["wiz"] = u(ks[9], (hidden_size, rnn_size), rnn_size)
    p["win"] = u(ks[10], (hidden_size, rnn_size), rnn_size)
    p["whr"] = u(ks[11], (rnn_size, rnn_size), rnn_size)
    p["whz"] = u(ks[12], (rnn_size, rnn_size), rnn_size)
    p["whn"] = u(ks[13], (rnn_size, rnn_size), rnn_size)
    kb = jax.random.split(ks[14], 6)
    p["bir"] = u(kb[0], (1, rnn_size), rnn_size)
    p["biz"] = u(kb[1], (1, rnn_size), rnn_size)
    p["bin"] = u(kb[2], (1, rnn_size), rnn_size)
    p["bhr"] = u(kb[3], (1, rnn_size), rnn_size)
    p["bhz"] = u(kb[4], (1, rnn_size), rnn_size)
    p["bhn"] = u(kb[5], (1, rnn_size), rnn_size)
    return p


def _batchnorm_ref(h, gamma, beta):
    mean = jnp.mean(h, axis=0, keepdims=True)
    var = jnp.mean((h - mean) ** 2, axis=0, keepdims=True)
    return (h - mean) * jax.lax.rsqrt(var + EPS) * gamma + beta


def _reference_forward(params, x, edge_index, edge_attr, u, batch, hidden):
    """Plain-JAX reference (unpacked params) for a correctness sanity check."""
    N = x.shape[0]
    row = edge_index[0]
    agg = jnp.zeros((N, edge_attr.shape[1]), x.dtype).at[row].add(edge_attr)
    h = jnp.concatenate([x, agg], axis=1)
    h = jnp.maximum(h @ params["w1"] + params["b1"], 0.0)
    h = _batchnorm_ref(h, params["g1"], params["be1"])
    h = jnp.maximum(h @ params["w2"] + params["b2"], 0.0)
    h = _batchnorm_ref(h, params["g2"], params["be2"])
    h0 = hidden[0]
    r = jax.nn.sigmoid(h @ params["wir"] + params["bir"] + h0 @ params["whr"] + params["bhr"])
    z = jax.nn.sigmoid(h @ params["wiz"] + params["biz"] + h0 @ params["whz"] + params["bhz"])
    n = jnp.tanh(h @ params["win"] + params["bin"] + r * (h0 @ params["whn"] + params["bhn"]))
    hn = (1.0 - z) * n + z * h0
    return hn, hn[None]


if __name__ == "__main__":
    NODE_F, EDGE_F, HIDDEN, RNN = 5, 3, 64, 20
    N, E, T = 16, 32, 8

    key = jax.random.PRNGKey(0)
    kp, kx, ke, ki, kh = jax.random.split(key, 5)

    raw = init_params(kp, NODE_F, EDGE_F, HIDDEN, RNN)
    packed = pack_params(raw, NODE_F, EDGE_F, HIDDEN, RNN)

    x = jax.random.normal(kx, (N, NODE_F), jnp.float32)
    edge_attr = jax.random.normal(ke, (E, EDGE_F), jnp.float32)
    edge_index = jax.random.randint(ki, (2, E), 0, N, jnp.int32)
    hidden = jax.random.normal(kh, (1, N, RNN), jnp.float32)
    u_global = jnp.zeros((1, 4), jnp.float32)   # unused, per reference forward
    batch = jnp.zeros((N,), jnp.int32)          # unused, per reference forward

    # ---- single-step forward (matches the PyTorch module's forward signature)
    fwd = jax.jit(node_rnn_1_forward)
    out, hn = fwd(packed, x, edge_index, edge_attr, u_global, batch, hidden)
    out = jax.block_until_ready(out)
    hn = jax.block_until_ready(hn)

    ref_out, ref_hn = _reference_forward(raw, x, edge_index, edge_attr, u_global, batch, hidden)
    assert out.shape == (N, RNN) and hn.shape == (1, N, RNN)
    assert jnp.allclose(out, ref_out, atol=1e-4, rtol=1e-4)
    assert jnp.allclose(hn, ref_hn, atol=1e-4, rtol=1e-4)

    # ---- multi-step driver: one pallas_call over T steps, weights DMA'd once
    kxs, kes, kis = jax.random.split(jax.random.PRNGKey(1), 3)
    x_seq = jax.random.normal(kxs, (T, N, NODE_F), jnp.float32)
    ea_seq = jax.random.normal(kes, (T, E, EDGE_F), jnp.float32)
    ei_seq = jax.random.randint(kis, (T, 2, E), 0, N, jnp.int32)

    fwd_seq = jax.jit(node_rnn_1_forward_seq)
    out_seq, hn_seq = fwd_seq(packed, x_seq, ei_seq, ea_seq, u_global, batch, hidden)
    out_seq = jax.block_until_ready(out_seq)
    hn_seq = jax.block_until_ready(hn_seq)

    # reference: step the plain-JAX cell T times
    h_ref = hidden
    refs = []
    for t in range(T):
        o_t, h_ref = _reference_forward(raw, x_seq[t], ei_seq[t], ea_seq[t],
                                        u_global, batch, h_ref)
        refs.append(o_t)
    ref_seq = jnp.stack(refs)
    assert out_seq.shape == (T, N, RNN) and hn_seq.shape == (1, N, RNN)
    assert jnp.allclose(out_seq, ref_seq, atol=1e-4, rtol=1e-4)
    assert jnp.allclose(hn_seq, ref_seq[-1][None], atol=1e-4, rtol=1e-4)

    print("KERNEL_OK")
</pallas_src>

<mosaic_0001>
module attributes {stable_mosaic.version = 11 : i64} {
  func.func @node_rnn_1_step_kernel(%arg0: i32, %arg1: memref<1x1x32xi32, #tpu.memory_space<vmem>>, %arg2: memref<1x16x5xf32, #tpu.memory_space<vmem>>, %arg3: memref<1x32x3xf32, #tpu.memory_space<vmem>>, %arg4: memref<16x20xf32, #tpu.memory_space<vmem>>, %arg5: memref<128x64xf32, #tpu.memory_space<vmem>>, %arg6: memref<64x64xf32, #tpu.memory_space<vmem>>, %arg7: memref<64x512xf32, #tpu.memory_space<vmem>>, %arg8: memref<128x512xf32, #tpu.memory_space<vmem>>, %arg9: memref<8x512xf32, #tpu.memory_space<vmem>>, %arg10: memref<1x16x128xf32, #tpu.memory_space<vmem>>, %arg11: memref<16x128xf32, #tpu.memory_space<vmem>>, %arg12: memref<16x128xf32, #tpu.memory_space<vmem>>) attributes {dimension_semantics = [#tpu.dimension_semantics<arbitrary>], iteration_bounds = array<i64: 1>, scalar_prefetch = 0 : i64, scratch_operands = 2 : i64, tpu.core_type = #tpu.core_type<tc>, window_params = [{transform_indices = @transform_0, window_bounds = array<i64: 1, 1, 32>}, {transform_indices = @transform_1, window_bounds = array<i64: 1, 16, 5>}, {transform_indices = @transform_2, window_bounds = array<i64: 1, 32, 3>}, {pipeline_mode = #tpu.pipeline_mode<synchronous>, transform_indices = @transform_3, window_bounds = array<i64: 16, 20>}, {pipeline_mode = #tpu.pipeline_mode<synchronous>, transform_indices = @transform_4, window_bounds = array<i64: 128, 64>}, {pipeline_mode = #tpu.pipeline_mode<synchronous>, transform_indices = @transform_5, window_bounds = array<i64: 64, 64>}, {pipeline_mode = #tpu.pipeline_mode<synchronous>, transform_indices = @transform_6, window_bounds = array<i64: 64, 512>}, {pipeline_mode = #tpu.pipeline_mode<synchronous>, transform_indices = @transform_7, window_bounds = array<i64: 128, 512>}, {pipeline_mode = #tpu.pipeline_mode<synchronous>, transform_indices = @transform_8, window_bounds = array<i64: 8, 512>}, {transform_indices = @transform_9, window_bounds = array<i64: 1, 16, 128>}]} {
    %c0_i32 = arith.constant 0 : i32
    %0 = arith.cmpi eq, %arg0, %c0_i32 : i32
    %1 = arith.extui %0 : i1 to i32
    %c0_i32_0 = arith.constant 0 : i32
    %2 = arith.cmpi ne, %1, %c0_i32_0 : i32
    scf.if %2 {
      %cst_57 = arith.constant 0.000000e+00 : f32
      %115 = vector.broadcast %cst_57 : f32 to vector<16x128xf32>
      %c0_58 = arith.constant 0 : index
      %c0_59 = arith.constant 0 : index
      %116 = vector.load %arg11[%c0_58, %c0_59] : memref<16x128xf32, #tpu.memory_space<vmem>>, vector<16x128xf32>
      tpu.vector_store %arg11[%c0_58, %c0_59], %115 {strides = array<i32>} : memref<16x128xf32, #tpu.memory_space<vmem>>, vector<16x128xf32>,
      %c0_60 = arith.constant 0 : index
      %c0_61 = arith.constant 0 : index
      %117 = vector.load %arg4[%c0_60, %c0_61] : memref<16x20xf32, #tpu.memory_space<vmem>>, vector<16x20xf32>
      %c0_62 = arith.constant 0 : index
      %c0_63 = arith.constant 0 : index
      %118 = vector.load %arg11[%c0_62, %c0_63] : memref<16x128xf32, #tpu.memory_space<vmem>>, vector<16x20xf32>
      tpu.vector_store %arg11[%c0_62, %c0_63], %117 {strides = array<i32>} : memref<16x128xf32, #tpu.memory_space<vmem>>, vector<16x20xf32>,
      %cst_64 = arith.constant 0.000000e+00 : f32
      %119 = vector.broadcast %cst_64 : f32 to vector<16x128xf32>
      %c0_65 = arith.constant 0 : index
      %c0_66 = arith.constant 0 : index
      %120 = vector.load %arg12[%c0_65, %c0_66] : memref<16x128xf32, #tpu.memory_space<vmem>>, vector<16x128xf32>
      tpu.vector_store %arg12[%c0_65, %c0_66], %119 {strides = array<i32>} : memref<16x128xf32, #tpu.memory_space<vmem>>, vector<16x128xf32>,
    } else {
    }
    %c0 = arith.constant 0 : index
    %c0_1 = arith.constant 0 : index
    %c0_2 = arith.constant 0 : index
    %3 = vector.load %arg1[%c0, %c0_1, %c0_2] : memref<1x1x32xi32, #tpu.memory_space<vmem>>, vector<1x1x32xi32>
    %4 = vector.shape_cast %3 : vector<1x1x32xi32> to vector<1x32xi32>
    %5 = tpu.iota {dimensions = array<i32: 0>} : vector<16x32xi32>
    %6 = vector.broadcast %4 : vector<1x32xi32> to vector<16x32xi32>
    %7 = arith.cmpi eq, %5, %6 : vector<16x32xi32>
    %8 = arith.extui %7 : vector<16x32xi1> to vector<16x32xi32>
    %9 = arith.sitofp %8 : vector<16x32xi32> to vector<16x32xf32>
    %c0_3 = arith.constant 0 : index
    %c0_4 = arith.constant 0 : index
    %c0_5 = arith.constant 0 : index
    %10 = vector.load %arg3[%c0_3, %c0_4, %c0_5] : memref<1x32x3xf32, #tpu.memory_space<vmem>>, vector<1x32x3xf32>
    %11 = vector.shape_cast %10 : vector<1x32x3xf32> to vector<32x3xf32>
    %cst = arith.constant dense<0.000000e+00> : vector<16x3xf32>
    %12 = tpu.matmul %9, %11, %cst {dimension_numbers = #tpu.dot_dimension_numbers<[1], [0], [0], [1], [0, 0, 1, 1], [], []>} : vector<16x32xf32>, vector<32x3xf32>, vector<16x3xf32> -> vector<16x3xf32>
    %c0_6 = arith.constant 0 : index
    %c0_7 = arith.constant 0 : index
    %c0_8 = arith.constant 0 : index
    %13 = vector.load %arg2[%c0_6, %c0_7, %c0_8] : memref<1x16x5xf32, #tpu.memory_space<vmem>>, vector<1x16x5xf32>
    %14 = vector.shape_cast %13 : vector<1x16x5xf32> to vector<16x5xf32>
    %c0_9 = arith.constant 0 : index
    %c0_10 = arith.constant 0 : index
    %15 = vector.load %arg12[%c0_9, %c0_10] : memref<16x128xf32, #tpu.memory_space<vmem>>, vector<16x5xf32>
    tpu.vector_store %arg12[%c0_9, %c0_10], %14 {strides = array<i32>} : memref<16x128xf32, #tpu.memory_space<vmem>>, vector<16x5xf32>,
    %c0_11 = arith.constant 0 : index
    %c5 = arith.constant 5 : index
    %16 = vector.load %arg12[%c0_11, %c5] : memref<16x128xf32, #tpu.memory_space<vmem>>, vector<16x3xf32>
    tpu.vector_store %arg12[%c0_11, %c5], %12 {strides = array<i32>} : memref<16x128xf32, #tpu.memory_space<vmem>>, vector<16x3xf32>,
    %c0_12 = arith.constant 0 : index
    %c0_13 = arith.constant 0 : index
    %17 = vector.load %arg12[%c0_12, %c0_13] : memref<16x128xf32, #tpu.memory_space<vmem>>, vector<16x128xf32>
    %c0_14 = arith.constant 0 : index
    %c0_15 = arith.constant 0 : index
    %18 = vector.load %arg5[%c0_14, %c0_15] : memref<128x64xf32, #tpu.memory_space<vmem>>, vector<128x64xf32>
    %cst_16 = arith.constant dense<0.000000e+00> : vector<16x64xf32>
    %19 = tpu.matmul %17, %18, %cst_16 {dimension_numbers = #tpu.dot_dimension_numbers<[1], [0], [0], [1], [0, 0, 1, 1], [], []>} : vector<16x128xf32>, vector<128x64xf32>, vector<16x64xf32> -> vector<16x64xf32>
    %c0_17 = arith.constant 0 : index
    %c0_18 = arith.constant 0 : index
    %20 = vector.load %arg9[%c0_17, %c0_18] : memref<8x512xf32, #tpu.memory_space<vmem>>, vector<1x64xf32>
    %21 = vector.broadcast %20 : vector<1x64xf32> to vector<16x64xf32>
    %22 = arith.addf %19, %21 : vector<16x64xf32>
    %cst_19 = arith.constant 0.000000e+00 : f32
    %23 = vector.broadcast %cst_19 : f32 to vector<16x64xf32>
    %24 = arith.maximumf %22, %23 : vector<16x64xf32>
    %c1 = arith.constant 1 : index
    %c0_20 = arith.constant 0 : index
    %25 = vector.load %arg9[%c1, %c0_20] : memref<8x512xf32, #tpu.memory_space<vmem>>, vector<1x64xf32>
    %c2 = arith.constant 2 : index
    %c0_21 = arith.constant 0 : index
    %26 = vector.load %arg9[%c2, %c0_21] : memref<8x512xf32, #tpu.memory_space<vmem>>, vector<1x64xf32>
    %cst_22 = arith.constant dense<0.000000e+00> : vector<64xf32>
    %27 = vector.multi_reduction <add>, %24, %cst_22 [0] : vector<16x64xf32> to vector<64xf32>
    %28 = vector.shape_cast %27 : vector<64xf32> to vector<1x64xf32>
    %cst_23 = arith.constant 1.600000e+01 : f32
    %29 = vector.broadcast %cst_23 : f32 to vector<1x64xf32>
    %30 = arith.divf %28, %29 : vector<1x64xf32>
    %31 = arith.mulf %24, %24 : vector<16x64xf32>
    %cst_24 = arith.constant dense<0.000000e+00> : vector<64xf32>
    %32 = vector.multi_reduction <add>, %31, %cst_24 [0] : vector<16x64xf32> to vector<64xf32>
    %33 = vector.shape_cast %32 : vector<64xf32> to vector<1x64xf32>
    %cst_25 = arith.constant 1.600000e+01 : f32
    %34 = vector.broadcast %cst_25 : f32 to vector<1x64xf32>
    %35 = arith.divf %33, %34 : vector<1x64xf32>
    %36 = arith.mulf %30, %30 : vector<1x64xf32>
    %37 = arith.subf %35, %36 : vector<1x64xf32>
    %38 = vector.broadcast %30 : vector<1x64xf32> to vector<16x64xf32>
    %39 = arith.subf %24, %38 : vector<16x64xf32>
    %cst_26 = arith.constant 9.99999974E-6 : f32
    %40 = vector.broadcast %cst_26 : f32 to vector<1x64xf32>
    %41 = arith.addf %37, %40 : vector<1x64xf32>
    %42 = math.rsqrt %41 : vector<1x64xf32>
    %43 = vector.broadcast %42 : vector<1x64xf32> to vector<16x64xf32>
    %44 = arith.mulf %39, %43 : vector<16x64xf32>
    %45 = vector.broadcast %25 : vector<1x64xf32> to vector<16x64xf32>
    %46 = arith.mulf %44, %45 : vector<16x64xf32>
    %47 = vector.broadcast %26 : vector<1x64xf32> to vector<16x64xf32>
    %48 = arith.addf %46, %47 : vector<16x64xf32>
    %c0_27 = arith.constant 0 : index
    %c0_28 = arith.constant 0 : index
    %49 = vector.load %arg6[%c0_27, %c0_28] : memref<64x64xf32, #tpu.memory_space<vmem>>, vector<64x64xf32>
    %cst_29 = arith.constant dense<0.000000e+00> : vector<16x64xf32>
    %50 = tpu.matmul %48, %49, %cst_29 {dimension_numbers = #tpu.dot_dimension_numbers<[1], [0], [0], [1], [0, 0, 1, 1], [], []>} : vector<16x64xf32>, vector<64x64xf32>, vector<16x64xf32> -> vector<16x64xf32>
    %c3 = arith.constant 3 : index
    %c0_30 = arith.constant 0 : index
    %51 = vector.load %arg9[%c3, %c0_30] : memref<8x512xf32, #tpu.memory_space<vmem>>, vector<1x64xf32>
    %52 = vector.broadcast %51 : vector<1x64xf32> to vector<16x64xf32>
    %53 = arith.addf %50, %52 : vector<16x64xf32>
    %cst_31 = arith.constant 0.000000e+00 : f32
    %54 = vector.broadcast %cst_31 : f32 to vector<16x64xf32>
    %55 = arith.maximumf %53, %54 : vector<16x64xf32>
    %c4 = arith.constant 4 : index
    %c0_32 = arith.constant 0 : index
    %56 = vector.load %arg9[%c4, %c0_32] : memref<8x512xf32, #tpu.memory_space<vmem>>, vector<1x64xf32>
    %c5_33 = arith.constant 5 : index
    %c0_34 = arith.constant 0 : index
    %57 = vector.load %arg9[%c5_33, %c0_34] : memref<8x512xf32, #tpu.memory_space<vmem>>, vector<1x64xf32>
    %cst_35 = arith.constant dense<0.000000e+00> : vector<64xf32>
    %58 = vector.multi_reduction <add>, %55, %cst_35 [0] : vector<16x64xf32> to vector<64xf32>
    %59 = vector.shape_cast %58 : vector<64xf32> to vector<1x64xf32>
    %cst_36 = arith.constant 1.600000e+01 : f32
    %60 = vector.broadcast %cst_36 : f32 to vector<1x64xf32>
    %61 = arith.divf %59, %60 : vector<1x64xf32>
    %62 = arith.mulf %55, %55 : vector<16x64xf32>
    %cst_37 = arith.constant dense<0.000000e+00> : vector<64xf32>
    %63 = vector.multi_reduction <add>, %62, %cst_37 [0] : vector<16x64xf32> to vector<64xf32>
    %64 = vector.shape_cast %63 : vector<64xf32> to vector<1x64xf32>
    %cst_38 = arith.constant 1.600000e+01 : f32
    %65 = vector.broadcast %cst_38 : f32 to vector<1x64xf32>
    %66 = arith.divf %64, %65 : vector<1x64xf32>
    %67 = arith.mulf %61, %61 : vector<1x64xf32>
    %68 = arith.subf %66, %67 : vector<1x64xf32>
    %69 = vector.broadcast %61 : vector<1x64xf32> to vector<16x64xf32>
    %70 = arith.subf %55, %69 : vector<16x64xf32>
    %cst_39 = arith.constant 9.99999974E-6 : f32
    %71 = vector.broadcast %cst_39 : f32 to vector<1x64xf32>
    %72 = arith.addf %68, %71 : vector<1x64xf32>
    %73 = math.rsqrt %72 : vector<1x64xf32>
    %74 = vector.broadcast %73 : vector<1x64xf32> to vector<16x64xf32>
    %75 = arith.mulf %70, %74 : vector<16x64xf32>
    %76 = vector.broadcast %56 : vector<1x64xf32> to vector<16x64xf32>
    %77 = arith.mulf %75, %76 : vector<16x64xf32>
    %78 = vector.broadcast %57 : vector<1x64xf32> to vector<16x64xf32>
    %79 = arith.addf %77, %78 : vector<16x64xf32>
    %c0_40 = arith.constant 0 : index
    %c0_41 = arith.constant 0 : index
    %80 = vector.load %arg11[%c0_40, %c0_41] : memref<16x128xf32, #tpu.memory_space<vmem>>, vector<16x128xf32>
    %c0_42 = arith.constant 0 : index
    %c0_43 = arith.constant 0 : index
    %81 = vector.load %arg7[%c0_42, %c0_43] : memref<64x512xf32, #tpu.memory_space<vmem>>, vector<64x512xf32>
    %cst_44 = arith.constant dense<0.000000e+00> : vector<16x512xf32>
    %82 = tpu.matmul %79, %81, %cst_44 {dimension_numbers = #tpu.dot_dimension_numbers<[1], [0], [0], [1], [0, 0, 1, 1], [], []>} : vector<16x64xf32>, vector<64x512xf32>, vector<16x512xf32> -> vector<16x512xf32>
    %c0_45 = arith.constant 0 : index
    %c0_46 = arith.constant 0 : index
    %83 = vector.load %arg8[%c0_45, %c0_46] : memref<128x512xf32, #tpu.memory_space<vmem>>, vector<128x512xf32>
    %cst_47 = arith.constant dense<0.000000e+00> : vector<16x512xf32>
    %84 = tpu.matmul %80, %83, %cst_47 {dimension_numbers = #tpu.dot_dimension_numbers<[1], [0], [0], [1], [0, 0, 1, 1], [], []>} : vector<16x128xf32>, vector<128x512xf32>, vector<16x512xf32> -> vector<16x512xf32>
    %85 = arith.addf %82, %84 : vector<16x512xf32>
    %c6 = arith.constant 6 : index
    %c0_48 = arith.constant 0 : index
    %86 = vector.load %arg9[%c6, %c0_48] : memref<8x512xf32, #tpu.memory_space<vmem>>, vector<1x512xf32>
    %87 = vector.broadcast %86 : vector<1x512xf32> to vector<16x512xf32>
    %88 = arith.addf %85, %87 : vector<16x512xf32>
    %89 = vector.extract_strided_slice %88 {offsets = [0, 0], sizes = [16, 128], strides = [1, 1]} : vector<16x512xf32> to vector<16x128xf32>
    %90 = arith.negf %89 : vector<16x128xf32>
    %91 = math.exp %90 : vector<16x128xf32>
    %cst_49 = arith.constant 1.000000e+00 : f32
    %92 = vector.broadcast %cst_49 : f32 to vector<16x128xf32>
    %93 = arith.addf %92, %91 : vector<16x128xf32>
    %94 = arith.divf %92, %93 : vector<16x128xf32>
    %95 = vector.extract_strided_slice %88 {offsets = [0, 128], sizes = [16, 128], strides = [1, 1]} : vector<16x512xf32> to vector<16x128xf32>
    %96 = arith.negf %95 : vector<16x128xf32>
    %97 = math.exp %96 : vector<16x128xf32>
    %cst_50 = arith.constant 1.000000e+00 : f32
    %98 = vector.broadcast %cst_50 : f32 to vector<16x128xf32>
    %99 = arith.addf %98, %97 : vector<16x128xf32>
    %100 = arith.divf %98, %99 : vector<16x128xf32>
    %101 = vector.extract_strided_slice %88 {offsets = [0, 256], sizes = [16, 128], strides = [1, 1]} : vector<16x512xf32> to vector<16x128xf32>
    %102 = vector.extract_strided_slice %88 {offsets = [0, 384], sizes = [16, 128], strides = [1, 1]} : vector<16x512xf32> to vector<16x128xf32>
    %103 = arith.mulf %94, %102 : vector<16x128xf32>
    %104 = arith.addf %101, %103 : vector<16x128xf32>
    %105 = math.tanh %104 : vector<16x128xf32>
    %cst_51 = arith.constant 1.000000e+00 : f32
    %106 = vector.broadcast %cst_51 : f32 to vector<16x128xf32>
    %107 = arith.subf %106, %100 : vector<16x128xf32>
    %108 = arith.mulf %107, %105 : vector<16x128xf32>
    %109 = arith.mulf %100, %80 : vector<16x128xf32>
    %110 = arith.addf %108, %109 : vector<16x128xf32>
    %c0_52 = arith.constant 0 : index
    %c0_53 = arith.constant 0 : index
    %111 = vector.load %arg11[%c0_52, %c0_53] : memref<16x128xf32, #tpu.memory_space<vmem>>, vector<16x128xf32>
    tpu.vector_store %arg11[%c0_52, %c0_53], %110 {strides = array<i32>} : memref<16x128xf32, #tpu.memory_space<vmem>>, vector<16x128xf32>,
    %c0_54 = arith.constant 0 : index
    %c0_55 = arith.constant 0 : index
    %c0_56 = arith.constant 0 : index
    %112 = vector.load %arg10[%c0_54, %c0_55, %c0_56] : memref<1x16x128xf32, #tpu.memory_space<vmem>>, vector<1x16x128xf32>
    %113 = vector.shape_cast %112 : vector<1x16x128xf32> to vector<16x128xf32>
    %114 = vector.shape_cast %110 : vector<16x128xf32> to vector<1x16x128xf32>
    tpu.vector_store %arg10[%c0_54, %c0_55, %c0_56], %114 {strides = array<i32>} : memref<1x16x128xf32, #tpu.memory_space<vmem>>, vector<1x16x128xf32>,
    return
  }
  func.func @transform_0(%arg0: i32) -> (i32, i32, i32) {
    %c0_i32 = arith.constant 0 : i32
    %c0_i32_0 = arith.constant 0 : i32
    %c0_i32_1 = arith.constant 0 : i32
    return %arg0, %c0_i32, %c0_i32_0 : i32, i32, i32
  }
  func.func @transform_1(%arg0: i32) -> (i32, i32, i32) {
    %c0_i32 = arith.constant 0 : i32
    %c0_i32_0 = arith.constant 0 : i32
    %c0_i32_1 = arith.constant 0 : i32
    return %arg0, %c0_i32, %c0_i32_0 : i32, i32, i32
  }
  func.func @transform_2(%arg0: i32) -> (i32, i32, i32) {
    %c0_i32 = arith.constant 0 : i32
    %c0_i32_0 = arith.constant 0 : i32
    %c0_i32_1 = arith.constant 0 : i32
    return %arg0, %c0_i32, %c0_i32_0 : i32, i32, i32
  }
  func.func @transform_3(%arg0: i32) -> (i32, i32) {
    %c0_i32 = arith.constant 0 : i32
    %c0_i32_0 = arith.constant 0 : i32
    %c0_i32_1 = arith.constant 0 : i32
    return %c0_i32, %c0_i32_0 : i32, i32
  }
  func.func @transform_4(%arg0: i32) -> (i32, i32) {
    %c0_i32 = arith.constant 0 : i32
    %c0_i32_0 = arith.constant 0 : i32
    %c0_i32_1 = arith.constant 0 : i32
    return %c0_i32, %c0_i32_0 : i32, i32
  }
  func.func @transform_5(%arg0: i32) -> (i32, i32) {
    %c0_i32 = arith.constant 0 : i32
    %c0_i32_0 = arith.constant 0 : i32
    %c0_i32_1 = arith.constant 0 : i32
    return %c0_i32, %c0_i32_0 : i32, i32
  }
  func.func @transform_6(%arg0: i32) -> (i32, i32) {
    %c0_i32 = arith.constant 0 : i32
    %c0_i32_0 = arith.constant 0 : i32
    %c0_i32_1 = arith.constant 0 : i32
    return %c0_i32, %c0_i32_0 : i32, i32
  }
  func.func @transform_7(%arg0: i32) -> (i32, i32) {
    %c0_i32 = arith.constant 0 : i32
    %c0_i32_0 = arith.constant 0 : i32
    %c0_i32_1 = arith.constant 0 : i32
    return %c0_i32, %c0_i32_0 : i32, i32
  }
  func.func @transform_8(%arg0: i32) -> (i32, i32) {
    %c0_i32 = arith.constant 0 : i32
    %c0_i32_0 = arith.constant 0 : i32
    %c0_i32_1 = arith.constant 0 : i32
    return %c0_i32, %c0_i32_0 : i32, i32
  }
  func.func @transform_9(%arg0: i32) -> (i32, i32, i32) {
    %c0_i32 = arith.constant 0 : i32
    %c0_i32_0 = arith.constant 0 : i32
    %c0_i32_1 = arith.constant 0 : i32
    return %arg0, %c0_i32, %c0_i32_0 : i32, i32, i32
  }
}

</mosaic_0001>

<bundles_post_ra>
// kernel: node_rnn_1_forward.1
= control target key start
LH: loop header
LB: loop body
LE: loop exit
PB: predicated region body
PF: predicated region fallthrough
CT: control target
= control target key end

     0   :  { %14 = vsyncpa [#allocation5], 0  ;;  %s1652_s0 = inlined_call_operand.vmem [shape: s32[1,1,32], index: 0, kind: input, shape index: {}]   ;;  %s1653_s1 = inlined_call_operand.vmem [shape: f32[1,16,5], index: 1, kind: input, shape index: {}]   ;;  %s1654_s2 = inlined_call_operand.vmem [shape: f32[1,32,3], index: 2, kind: input, shape index: {}]   ;;  %s1655_s3 = inlined_call_operand.vmem [shape: f32[16,20], index: 3, kind: input, shape index: {}]   ;;  %s1656_s4 = inlined_call_operand.vmem [shape: f32[128,64], index: 4, kind: input, shape index: {}]   ;;  %s1657_s5 = inlined_call_operand.hbm [shape: f32[64,64], index: 5, kind: input, shape index: {}]   ;;  %s1658_s6 = inlined_call_operand.vmem [shape: f32[64,512], index: 6, kind: input, shape index: {}]   ;;  %s1659_s7 = inlined_call_operand.hbm [shape: f32[128,512], index: 7, kind: input, shape index: {}]   ;;  %s1660_s8 = inlined_call_operand.hbm [shape: f32[8,512], index: 8, kind: input, shape index: {}]   ;;  %s1661_s9 = inlined_call_operand.vmem [shape: f32[1,16,128], index: 9, kind: output, shape index: {}]  }
   0x1   :  { %15 = vsyncpa [#allocation7], 0  ;;  %s1330_s30 = smov [#allocation6]   ;;  %s1260_s13 = scalar_lea.hbm %s1659_s7, 8192 }
   0x2   :  { %s45_s10 = sshll.u32 %s1330_s30, 4  ;;  %p1261_p0 = scmp.ne.s32.totalorder %s1659_s7, %s1260_s13  ;;  %s46_s10 = int_to_ptr.vmem [resolvable:$true] %s45_s10 }
   0x3   :  { %p1264_p1 = scmp.lt.u32.totalorder %s1260_s13, %s1659_s7 }
   0x5   :  { %p1266_p2 = pnand %p1264_p1, %p1261_p0 }
   0x7   :  { %1269 = shalt.err (!%p1266_p2)
}
   0x8   :  { %s1270_s18 = scalar_lea.vmem %s46_s10, 8192  ;;  %p1275_p4 = scmp.lt.s32.totalorder %s46_s10, %s46_s10 }
   0x9   :  { %p1271_p3 = scmp.ne.s32.totalorder %s46_s10, %s1270_s18  ;;  %p1276_p5 = scmp.lt.s32.totalorder %s1270_s18, %s1270_s18 }
   0xb   :  { %p1277_p6 = por %p1276_p5, %p1275_p4 }
   0xd   :  { %p1278_p7 = pnand %p1277_p6, %p1271_p3 }
   0xf   :  { %1281 = shalt.err (!%p1278_p7)
}
  0x10   :  { %s1331_s19 = smov 512   ;;  %s1332_s20 = smov 32  }
  0x11   :  { %51 = dma.hbm_to_vmem [thread:$0]  %s1659_s7, 8192, %s46_s10, [#allocation7], %s1331_s19, %s1331_s19, %s1332_s20  }
  0x12   :  { %s1333_s23 = smov [#allocation4]   ;;  %s1282_s27 = scalar_lea.hbm %s1657_s5, 1024 }
  0x13   :  { %s31_s24 = sshll.u32 %s1333_s23, 4  ;;  %p1283_p8 = scmp.ne.s32.totalorder %s1657_s5, %s1282_s27  ;;  %s32_s24 = int_to_ptr.vmem [resolvable:$true] %s31_s24 }
  0x14   :  { %p1286_p9 = scmp.lt.u32.totalorder %s1282_s27, %s1657_s5 }
  0x16   :  { %p1288_p10 = pnand %p1286_p9, %p1283_p8 }
  0x18   :  { %1291 = shalt.err (!%p1288_p10)
}
  0x19   :  { %s1292_s12 = scalar_lea.vmem %s32_s24, 1024  ;;  %p1297_p12 = scmp.lt.s32.totalorder %s32_s24, %s32_s24 }
  0x1a   :  { %p1293_p11 = scmp.ne.s32.totalorder %s32_s24, %s1292_s12  ;;  %p1298_p13 = scmp.lt.s32.totalorder %s1292_s12, %s1292_s12 }
  0x1c   :  { %p1299_p0 = por %p1298_p13, %p1297_p12 }
  0x1e   :  { %p1300_p1 = pnand %p1299_p0, %p1293_p11 }
  0x20   :  { %1303 = shalt.err (!%p1300_p1)
}
  0x21   :  { %s1334_s7 = smov 128   ;;  %s1335_s10 = smov 8  }
  0x22   :  { %37 = dma.hbm_to_vmem [thread:$0]  %s1657_s5, 1024, %s32_s24, [#allocation5], %s1334_s7, %s1334_s7, %s1335_s10  }
  0x23   :  { %s1336_s15 = smov [#allocation8]   ;;  %s1304_s19 = scalar_lea.hbm %s1660_s8, 512 }
  0x24   :  { %s58_s16 = sshll.u32 %s1336_s15, 4  ;;  %p1305_p2 = scmp.ne.s32.totalorder %s1660_s8, %s1304_s19  ;;  %s59_s16 = int_to_ptr.vmem [resolvable:$true] %s58_s16 }
  0x25   :  { %p1308_p3 = scmp.lt.u32.totalorder %s1304_s19, %s1660_s8 }
  0x27   :  { %p1310_p4 = pnand %p1308_p3, %p1305_p2 }
  0x29   :  { %1313 = shalt.err (!%p1310_p4)
}
  0x2a   :  { %s1314_s25 = scalar_lea.vmem %s59_s16, 512  ;;  %p1319_p6 = scmp.lt.s32.totalorder %s59_s16, %s59_s16 }
  0x2b   :  { %p1315_p5 = scmp.ne.s32.totalorder %s59_s16, %s1314_s25  ;;  %p1320_p7 = scmp.lt.s32.totalorder %s1314_s25, %s1314_s25 }
  0x2d   :  { %p1321_p8 = por %p1320_p7, %p1319_p6 }
  0x2f   :  { %p1322_p9 = pnand %p1321_p8, %p1315_p5 }
  0x31   :  { %1325 = shalt.err (!%p1322_p9)
}
  0x32   :  { %61 = dma.hbm_to_vmem [thread:$0]  %s1660_s8, 512, %s59_s16, [#allocation7]  }
  0x33   :  { %1326 = dma.done.wait [#allocation5], 1024  }
  0x34   :  { %1327 = vsyncadd [#allocation5], 4294966272 }
  0x35   :  { %1328 = dma.done.wait [#allocation7], 8704  }
  0x36   :  { %1329 = vsyncadd [#allocation7], 4294958592  ;;  %v85_v0 = vlaneseq  ;;  %v1337_v1 = vmov 0.0   ;;  %v98_v3 = vld [vmem:[%s1654_s2] sm:$0xff]  ;;  %v99_v4 = vld [vmem:[%s1654_s2 + $0x8] sm:$0xff]  ;;  %vm102_vm0 = vcmask 261120  }
  0x37   :  { %75 = vst [vmem:[#allocation2] sm:$0xff] %v1337_v1  ;;  %76 = vst [vmem:[#allocation2 + $0x8] sm:$0xff] %v1337_v1  ;;  %v100_v5 = vld [vmem:[%s1654_s2 + $0x10] sm:$0xff]  ;;  %v1067_v6 = vpack.c.bf16 %v99_v4, %v98_v3  ;;  %v101_v7 = vld [vmem:[%s1654_s2 + $0x18] sm:$0xff]  ;;  %vm186_vm3 = vcmask 39936   ;;  %vm197_vm4 = vcmask 64552  }
  0x38   :  { %82 = vst [vmem:[#allocation3] sm:$0xff] %v1337_v1  ;;  %83 = vst [vmem:[#allocation3 + $0x8] sm:$0xff] %v1337_v1  ;;  %v1429_v2 = vshrl.u32 %v85_v0, 7  ;;  %v953_v8 = vld [vmem:[%s1652_s0] ss:$0 sm:$0xff]  ;;  %v1071_v10 = vpack.c.bf16 %v101_v7, %v100_v5  ;;  %v203_v14 = vld [vmem:[%s1656_s4 + $0x8] sm:$0xff] }
  0x39   :  { %1068 = vmatprep.subr.bf16.mxu0 %v1067_v6  ;;  %v202_v13 = vld [vmem:[%s1656_s4] sm:$0xff]  ;;  %v204_v15 = vld [vmem:[%s1656_s4 + $0x10] sm:$0xff]  ;;  %v205_v17 = vld [vmem:[%s1656_s4 + $0x18] sm:$0xff]  ;;  %vm298_vm5 = vcmask 523264   ;;  %vm79_vm6 = vcmask 162816  }
  0x3a   :  { %v87_v9 = vadd.s32 8, %v1429_v2  ;;  %vm92_vm1 = vcmp.eq.s32.totalorder %v1429_v2, %v953_v8  ;;  %1070 = vmatpush3.bf16.msra.mxu0 %v1067_v6  ;;  %v1075_v16 = vpack.c.bf16 %v203_v14, %v202_v13  ;;  %v1079_v18 = vpack.c.bf16 %v205_v17, %v204_v15  ;;  %v206_v19 = vld [vmem:[%s1656_s4 + $0x20] sm:$0xff]  ;;  %v207_v20 = vld [vmem:[%s1656_s4 + $0x28] sm:$0xff]  ;;  %v208_v23 = vld [vmem:[%s1656_s4 + $0x30] sm:$0xff] }
  0x3b   :  { %v954_v11 = vsel %vm92_vm1, 1.0, %v1337_v1  ;;  %1072 = vmatprep.subr.bf16.mxu0 %v1071_v10  ;;  %v184_v21 = vld [vmem:[%s1653_s1] sm:$0xff]  ;;  %v1083_v22 = vpack.c.bf16 %v207_v20, %v206_v19  ;;  %v209_v24 = vld [vmem:[%s1656_s4 + $0x38] sm:$0xff]  ;;  %v211_v27 = vld [vmem:[%s1656_s4 + $0x48] sm:$0xff] }
  0x3c   :  { %1010 = vmatprep.mubr.msk.f32.mxu0 %vm102_vm0, %v954_v11  ;;  %vm93_vm2 = vcmp.eq.s32.totalorder %v87_v9, %v953_v8  ;;  %1076 = vmatprep.subr.bf16.mxu1 %v1075_v16  ;;  %187 = vst.msk [vmem:[#allocation3] sm:$0xff] %vm186_vm3, %v184_v21  ;;  %v1087_v25 = vpack.c.bf16 %v209_v24, %v208_v23  ;;  %v210_v26 = vld [vmem:[%s1656_s4 + $0x40] sm:$0xff]  ;;  %v212_v29 = vld [vmem:[%s1656_s4 + $0x50] sm:$0xff]  ;;  %v213_v30 = vld [vmem:[%s1656_s4 + $0x58] sm:$0xff] }
  0x3d   :  { %v955_v12 = vsel %vm93_vm2, 1.0, %v1337_v1  ;;  %1078 = vmatpush3.bf16.msra.mxu1 %v1075_v16  ;;  %v1091_v28 = vpack.c.bf16 %v211_v27, %v210_v26  ;;  %v1095_v31 = vpack.c.bf16 %v213_v30, %v212_v29  ;;  %v185_v32 = vld [vmem:[%s1653_s1 + $0x8] sm:$0xff]  ;;  %v214_v33 = vld [vmem:[%s1656_s4 + $0x60] sm:$0xff]  ;;  %v216_v36 = vld [vmem:[%s1656_s4 + $0x70] sm:$0xff]  ;;  %s1338_s1 = smov 5  }
  0x3e   :  { %1074 = vmatpush3.bf16.msra.mxu0 %v1071_v10  ;;  %1080 = vmatprep.subr.bf16.mxu1 %v1079_v18  ;;  %188 = vst.msk [vmem:[#allocation3 + $0x8] sm:$0xff] %vm186_vm3, %v185_v32  ;;  %v215_v34 = vld [vmem:[%s1656_s4 + $0x68] sm:$0xff]  ;;  %v217_v37 = vld [vmem:[%s1656_s4 + $0x78] sm:$0xff]  ;;  %v334_v45 = vld [vmem:[#allocation4] sm:$0xff] }
  0x3f   :  { %v1099_v35 = vpack.c.bf16 %v215_v34, %v214_v33  ;;  %v1103_v38 = vpack.c.bf16 %v217_v37, %v216_v36  ;;  %v335_v46 = vld [vmem:[#allocation4 + $0x8] sm:$0xff]  ;;  %v336_v48 = vld [vmem:[#allocation4 + $0x10] sm:$0xff]  ;;  %v337_v49 = vld [vmem:[#allocation4 + $0x18] sm:$0xff] }
  0x40   :  { %v1107_v47 = vpack.c.bf16 %v335_v46, %v334_v45  ;;  %v1111_v50 = vpack.c.bf16 %v337_v49, %v336_v48  ;;  %v338_v51 = vld [vmem:[#allocation4 + $0x20] sm:$0xff]  ;;  %v339_v52 = vld [vmem:[#allocation4 + $0x28] sm:$0xff]  ;;  %v340_v54 = vld [vmem:[#allocation4 + $0x30] sm:$0xff] }
  0x41   :  { %1011 = vmatmul.mubr.msk.f32.vlgmr.msra.gmra.mrb[0].mxu0 %vm102_vm0, %v955_v12  ;;  %1082 = vmatpush3.bf16.msra.mxu1 %v1079_v18  ;;  %v1115_v53 = vpack.c.bf16 %v339_v52, %v338_v51  ;;  %v341_v55 = vld [vmem:[#allocation4 + $0x38] sm:$0xff]  ;;  %v497_v57 = vld [vmem:[#allocation6 + $0x8] sm:$0xff]  ;;  %v498_v63 = vld [vmem:[#allocation6 + $0x10] sm:$0xff] }
  0x42   :  { %1084 = vmatprep.subr.bf16.mxu1 %v1083_v22  ;;  %1108 = vmatprep.subr.bf16.mxu0 %v1107_v47  ;;  %v1119_v56 = vpack.c.bf16 %v341_v55, %v340_v54  ;;  %v501_v58 = vld [vmem:[#allocation6 + $0x28] sm:$0xff]  ;;  %v499_v59 = vld [vmem:[#allocation6 + $0x18] sm:$0xff]  ;;  %v502_v0 = vld [vmem:[#allocation6 + $0x30] sm:$0xff] }
  0x43   :  { %1110 = vmatpush3.bf16.msra.mxu0 %v1107_v47  ;;  %v1123_v60 = vpack.c.bf16 %v501_v58, %v497_v57  ;;  %v503_v61 = vld [vmem:[#allocation6 + $0x38] sm:$0xff]  ;;  %v1157_v3 = vpack.c.bf16 %v502_v0, %v498_v63  ;;  %v218_v4 = vld [vmem:[#allocation8] ss:$0 sm:$0xff]  ;;  %v509_v51 = vld [vmem:[#allocation6 + $0x68] sm:$0xff] }
  0x44   :  { %1112 = vmatprep.subr.bf16.mxu0 %v1111_v50  ;;  %v1155_v62 = vpack.c.bf16 %v503_v61, %v499_v59  ;;  %v507_v52 = vld [vmem:[#allocation6 + $0x58] sm:$0xff]  ;;  %v504_v55 = vld [vmem:[#allocation6 + $0x40] sm:$0xff]  ;;  %v506_v58 = vld [vmem:[#allocation6 + $0x50] sm:$0xff] }
  0x45   :  { %1086 = vmatpush3.bf16.msra.mxu1 %v1083_v22  ;;  %v511_v54 = vld [vmem:[#allocation6 + $0x78] sm:$0xff]  ;;  %v508_v57 = vld [vmem:[#allocation6 + $0x60] sm:$0xff]  ;;  %v510_v59 = vld [vmem:[#allocation6 + $0x70] sm:$0xff] }
  0x46   :  { %1088 = vmatprep.subr.bf16.mxu1 %v1087_v25  ;;  %v1161_v61 = vpack.c.bf16 %v510_v59, %v506_v58  ;;  %v517_v63 = vld [vmem:[#allocation6 + $0xa8] sm:$0xff]  ;;  %v515_v0 = vld [vmem:[#allocation6 + $0x98] sm:$0xff]  ;;  %v550_v58 = vld [vmem:[#allocation6 + $0x1b0] sm:$0xff] }
  0x47   :  { %1114 = vmatpush3.bf16.msra.mxu0 %v1111_v50  ;;  %v505_v50 = vld [vmem:[#allocation6 + $0x48] sm:$0xff] }
  0x48   :  { %1116 = vmatprep.subr.bf16.mxu0 %v1115_v53 }
  0x49   :  { %1090 = vmatpush3.bf16.msra.mxu1 %v1087_v25 }
  0x4a   :  { %1092 = vmatprep.subr.bf16.mxu1 %v1091_v28 }
  0x4b   :  { %1118 = vmatpush3.bf16.msra.mxu0 %v1115_v53  ;;  %v1127_v53 = vpack.c.bf16 %v509_v51, %v505_v50  ;;  %v547_v50 = vld [vmem:[#allocation6 + $0x198] sm:$0xff] }
  0x4c   :  { %1120 = vmatprep.subr.bf16.mxu0 %v1119_v56 }
  0x4d   :  { %1094 = vmatpush3.bf16.msra.mxu1 %v1091_v28 }
  0x4e   :  { %1096 = vmatprep.subr.bf16.mxu1 %v1095_v31 }
  0x4f   :  { %1122 = vmatpush3.bf16.msra.mxu0 %v1119_v56  ;;  %v1159_v56 = vpack.c.bf16 %v511_v54, %v507_v52  ;;  %v551_v52 = vld [vmem:[#allocation6 + $0x1b8] sm:$0xff]  ;;  %v548_v54 = vld [vmem:[#allocation6 + $0x1a0] sm:$0xff] }
  0x50   :  { %1124 = vmatprep.subr.bf16.mxu0 %v1123_v60  ;;  %v1129_v60 = vpack.c.bf16 %v508_v57, %v504_v55  ;;  %v1179_v55 = vpack.c.bf16 %v551_v52, %v547_v50  ;;  %v546_v57 = vld [vmem:[#allocation6 + $0x190] sm:$0xff]  ;;  %v493_v50 = vld [vmem:[%s1658_s6 + $0xe8] sm:$0xff] }
  0x51   :  { %1098 = vmatpush3.bf16.msra.mxu1 %v1095_v31  ;;  %v1181_v59 = vpack.c.bf16 %v550_v58, %v546_v57 }
  0x52   :  { %1100 = vmatprep.subr.bf16.mxu1 %v1099_v35 }
  0x55   :  { %1102 = vmatpush3.bf16.msra.mxu1 %v1099_v35 }
  0x56   :  { %1104 = vmatprep.subr.bf16.mxu1 %v1103_v38 }
  0x59   :  { %1106 = vmatpush3.bf16.msra.mxu1 %v1103_v38 }
  0x5a   :  { %1156 = vmatprep.subr.bf16.mxu1 %v1155_v62  ;;  %v513_v62 = vld [vmem:[#allocation6 + $0x88] sm:$0xff] }
 0x114   :  { %v1012_v39 = vpop.f32.mrb[0].mxu0 }
 0x115   :  { %v175_v40 = vpop.f32.mrb[1].mxu0 }
 0x116   :  { %191 = vrot.lane.b32.xlu0 %v175_v40, %s1338_s1 }
 0x11a   :  { %193 = vrot.lane.b32.xlu0 %v1012_v39, %s1338_s1  ;;  %v296_v39 = vld [vmem:[#allocation8 + $0x1] ss:$0 sm:$0xff] }
 0x188   :  { %v192_v41 = vpop.permute.xlu0 %191 }
 0x189   :  { %198 = vst.msk [vmem:[#allocation3] sm:$0xff] %vm197_vm4, %v192_v41 }
 0x18c   :  { %v194_v42 = vpop.permute.xlu0 %193 }
 0x18d   :  { %199 = vst.msk [vmem:[#allocation3 + $0x8] sm:$0xff] %vm197_vm4, %v194_v42  ;;  %v297_v42 = vld [vmem:[#allocation8 + $0x2] ss:$0 sm:$0xff] }
 0x190   :  { %v200_v43 = vld [vmem:[#allocation3] sm:$0xff] }
 0x191   :  { %1045 = vmatprep.mubr.f32.mxu1 %v200_v43  ;;  %v496_v43 = vld [vmem:[#allocation6] sm:$0xff] }
 0x194   :  { %v201_v44 = vld [vmem:[#allocation3 + $0x8] sm:$0xff] }
 0x195   :  { %1046 = vmatmul.mubr.f32.vlgmr.msra.gmra.mrb[0].mxu1 %v201_v44  ;;  %v500_v44 = vld [vmem:[#allocation6 + $0x20] sm:$0xff] }
 0x196   :  { %701 = vmatprep.mubr.f32.mxu1 %v1337_v1  ;;  %1158 = vmatpush1.bf16.msra.mxu1 %v1157_v3  ;;  %v1125_v49 = vpack.c.bf16 %v500_v44, %v496_v43  ;;  %v1131_v3 = vpack.c.bf16 %v517_v63, %v513_v62  ;;  %v557_v62 = vld [vmem:[#allocation6 + $0x1e8] sm:$0xff]  ;;  %v555_v63 = vld [vmem:[#allocation6 + $0x1d8] sm:$0xff] }
 0x197   :  { %1160 = vmatprep.subr.bf16.mxu1 %v1159_v56 }
 0x19a   :  { %1162 = vmatpush1.bf16.msra.mxu1 %v1161_v61  ;;  %v553_v61 = vld [vmem:[#allocation6 + $0x1c8] sm:$0xff] }
 0x268   :  { %v1047_v5 = vpop.f32.mrb[0].mxu1 }
 0x269   :  { %v291_v6 = vadd.f32 %v1047_v5, %v218_v4  ;;  %v285_v7 = vpop.f32.mrb[1].mxu1  ;;  %v512_v5 = vld [vmem:[#allocation6 + $0x80] sm:$0xff] }
 0x26a   :  { %v286_v8 = vadd.f32 %v285_v7, %v218_v4  ;;  %v519_v4 = vld [vmem:[#allocation6 + $0xb8] sm:$0xff] }
 0x26b   :  { %v295_v9 = vmax.f32 %v291_v6, 0.0  ;;  %v516_v6 = vld [vmem:[#allocation6 + $0xa0] sm:$0xff]  ;;  %v1163_v7 = vpack.c.bf16 %v519_v4, %v515_v0  ;;  %v1151_v0 = vpack.c.bf16 %v557_v62, %v553_v61 }
 0x26c   :  { %v294_v10 = vmax.f32 %v286_v8, 0.0  ;;  %v1133_v8 = vpack.c.bf16 %v516_v6, %v512_v5  ;;  %v552_v4 = vld [vmem:[#allocation6 + $0x1c0] sm:$0xff] }
 0x26d   :  { %v300_v11 = vsel %vm298_vm5, %v295_v9, 0.0  ;;  %v311_v12 = vmul.f32 %v295_v9, %v295_v9  ;;  %1164 = vmatprep.subr.bf16.mxu1 %v1163_v7  ;;  %v556_v5 = vld [vmem:[#allocation6 + $0x1e0] sm:$0xff] }
 0x26e   :  { %v299_v13 = vsel %vm298_vm5, %v294_v10, 0.0  ;;  %v310_v14 = vmul.f32 %v294_v10, %v294_v10  ;;  %v1153_v7 = vpack.c.bf16 %v556_v5, %v552_v4  ;;  %v342_v62 = vld [vmem:[#allocation8 + $0x3] ss:$0 sm:$0xff] }
 0x26f   :  { %v313_v15 = vsel %vm298_vm5, %v311_v12, 0.0  ;;  %v301_v16 = vadd.f32 %v300_v11, %v299_v13  ;;  %v521_v12 = vld [vmem:[#allocation6 + $0xc8] sm:$0xff] }
 0x270   :  { %v312_v17 = vsel %vm298_vm5, %v310_v14, 0.0  ;;  %v525_v13 = vld [vmem:[#allocation6 + $0xe8] sm:$0xff]  ;;  %v523_v14 = vld [vmem:[#allocation6 + $0xd8] sm:$0xff] }
 0x271   :  { %v302_v18 = vrot.slane %v301_v16, 4  ;;  %v314_v19 = vadd.f32 %v313_v15, %v312_v17  ;;  %v527_v15 = vld [vmem:[#allocation6 + $0xf8] sm:$0xff] }
 0x272   :  { %v1167_v17 = vpack.c.bf16 %v527_v15, %v523_v14  ;;  %v471_v15 = vld [vmem:[%s1658_s6 + $0x38] sm:$0xff] }
 0x273   :  { %v303_v20 = vadd.f32 %v302_v18, %v301_v16  ;;  %v315_v21 = vrot.slane %v314_v19, 4  ;;  %v1135_v16 = vpack.c.bf16 %v525_v13, %v521_v12  ;;  %v520_v18 = vld [vmem:[#allocation6 + $0xc0] sm:$0xff]  ;;  %v469_v12 = vld [vmem:[%s1658_s6 + $0x28] sm:$0xff]  ;;  %v467_v13 = vld [vmem:[%s1658_s6 + $0x18] sm:$0xff] }
 0x275   :  { %v304_v22 = vrot.slane %v303_v20, 2  ;;  %v316_v23 = vadd.f32 %v315_v21, %v314_v19  ;;  %v524_v19 = vld [vmem:[#allocation6 + $0xe0] sm:$0xff] }
 0x276   :  { %v1137_v21 = vpack.c.bf16 %v524_v19, %v520_v18  ;;  %v1203_v18 = vpack.c.bf16 %v471_v15, %v467_v13 }
 0x277   :  { %v305_v24 = vadd.f32 %v304_v22, %v303_v20  ;;  %v317_v25 = vrot.slane %v316_v23, 2  ;;  %v522_v20 = vld [vmem:[#allocation6 + $0xd0] sm:$0xff] }
 0x278   :  { %v526_v22 = vld [vmem:[#allocation6 + $0xf0] sm:$0xff] }
 0x279   :  { %v306_v26 = vrot.slane %v305_v24, 1  ;;  %v318_v27 = vadd.f32 %v317_v25, %v316_v23  ;;  %v1169_v23 = vpack.c.bf16 %v526_v22, %v522_v20  ;;  %v533_v25 = vld [vmem:[#allocation6 + $0x128] sm:$0xff]  ;;  %v466_v20 = vld [vmem:[%s1658_s6 + $0x10] sm:$0xff] }
 0x27b   :  { %v307_v28 = vadd.f32 %v306_v26, %v305_v24  ;;  %v319_v29 = vrot.slane %v318_v27, 1  ;;  %v529_v24 = vld [vmem:[#allocation6 + $0x108] sm:$0xff]  ;;  %v531_v26 = vld [vmem:[#allocation6 + $0x118] sm:$0xff] }
 0x27d   :  { %v309_v30 = vmul.f32 0.0625, %v307_v28  ;;  %v320_v31 = vadd.f32 %v319_v29, %v318_v27  ;;  %v1139_v27 = vpack.c.bf16 %v533_v25, %v529_v24  ;;  %v535_v28 = vld [vmem:[#allocation6 + $0x138] sm:$0xff]  ;;  %v528_v29 = vld [vmem:[#allocation6 + $0x100] sm:$0xff]  ;;  %v473_v24 = vld [vmem:[%s1658_s6 + $0x48] sm:$0xff] }
 0x27e   :  { %v477_v25 = vld [vmem:[%s1658_s6 + $0x68] sm:$0xff] }
 0x27f   :  { %v321_v32 = vmul.f32 0.0625, %v320_v31  ;;  %v322_v33 = vmul.f32 %v309_v30, %v309_v30  ;;  %v324_v34 = vsub.f32 %v294_v10, %v309_v30  ;;  %v325_v35 = vsub.f32 %v295_v9, %v309_v30  ;;  %v514_v9 = vld [vmem:[#allocation6 + $0x90] sm:$0xff]  ;;  %v532_v30 = vld [vmem:[#allocation6 + $0x120] sm:$0xff] }
 0x280   :  { %v518_v10 = vld [vmem:[#allocation6 + $0xb0] sm:$0xff]  ;;  %v1171_v31 = vpack.c.bf16 %v535_v28, %v531_v26  ;;  %v475_v26 = vld [vmem:[%s1658_s6 + $0x58] sm:$0xff] }
 0x281   :  { %v323_v36 = vsub.f32 %v321_v32, %v322_v33  ;;  %v1165_v11 = vpack.c.bf16 %v518_v10, %v514_v9  ;;  %v1141_v32 = vpack.c.bf16 %v532_v30, %v528_v29  ;;  %v530_v33 = vld [vmem:[#allocation6 + $0x110] sm:$0xff]  ;;  %v479_v28 = vld [vmem:[%s1658_s6 + $0x78] sm:$0xff]  ;;  %v472_v29 = vld [vmem:[%s1658_s6 + $0x40] sm:$0xff] }
 0x282   :  { %v558_v9 = vld [vmem:[#allocation6 + $0x1f0] sm:$0xff]  ;;  %v476_v30 = vld [vmem:[%s1658_s6 + $0x60] sm:$0xff] }
 0x283   :  { %v326_v37 = vadd.f32 1e-05, %v323_v36  ;;  %1166 = vmatpush1.bf16.msra.mxu1 %v1165_v11  ;;  %v537_v36 = vld [vmem:[#allocation6 + $0x148] sm:$0xff] }
 0x284   :  { %1168 = vmatprep.subr.bf16.mxu1 %v1167_v17  ;;  %v465_v11 = vld [vmem:[%s1658_s6 + $0x8] sm:$0xff]  ;;  %v468_v17 = vld [vmem:[%s1658_s6 + $0x20] sm:$0xff] }
 0x285   :  { %1236 = vrsqrt.f32 %v326_v37  ;;  %v541_v37 = vld [vmem:[#allocation6 + $0x168] sm:$0xff]  ;;  %v1187_v14 = vpack.c.bf16 %v469_v12, %v465_v11 }
 0x287   :  { %1170 = vmatpush1.bf16.msra.mxu1 %v1169_v23 }
 0x288   :  { %1172 = vmatprep.subr.bf16.mxu1 %v1171_v31  ;;  %v1207_v31 = vpack.c.bf16 %v479_v28, %v475_v26 }
 0x28f   :  { %v1237_v38 = vpop.eup %1236 }
 0x290   :  { %v328_v40 = vmul.f32 %v1237_v38, %v324_v34  ;;  %v329_v41 = vmul.f32 %v1237_v38, %v325_v35  ;;  %v534_v34 = vld [vmem:[#allocation6 + $0x130] sm:$0xff]  ;;  %v539_v38 = vld [vmem:[#allocation6 + $0x158] sm:$0xff] }
 0x291   :  { %v1173_v35 = vpack.c.bf16 %v534_v34, %v530_v33  ;;  %v474_v33 = vld [vmem:[%s1658_s6 + $0x50] sm:$0xff] }
 0x292   :  { %v330_v45 = vmul.f32 %v328_v40, %v296_v39  ;;  %v331_v46 = vmul.f32 %v329_v41, %v296_v39  ;;  %v1143_v39 = vpack.c.bf16 %v541_v37, %v537_v36  ;;  %v543_v40 = vld [vmem:[#allocation6 + $0x178] sm:$0xff]  ;;  %v536_v41 = vld [vmem:[#allocation6 + $0x140] sm:$0xff]  ;;  %v478_v34 = vld [vmem:[%s1658_s6 + $0x70] sm:$0xff] }
 0x293   :  { %1174 = vmatpush1.bf16.msra.mxu1 %v1173_v35  ;;  %v1175_v43 = vpack.c.bf16 %v543_v40, %v539_v38  ;;  %v78_v35 = vld [vmem:[%s1655_s3 + $0x8] sm:$0xff]  ;;  %v1209_v36 = vpack.c.bf16 %v478_v34, %v474_v33 }
 0x294   :  { %v332_v47 = vadd.f32 %v330_v45, %v297_v42  ;;  %v333_v48 = vadd.f32 %v331_v46, %v297_v42  ;;  %v540_v42 = vld [vmem:[#allocation6 + $0x160] sm:$0xff]  ;;  %v538_v45 = vld [vmem:[#allocation6 + $0x150] sm:$0xff]  ;;  %81 = vst.msk [vmem:[#allocation2 + $0x8] sm:$0xff] %vm79_vm6, %v78_v35  ;;  %v481_v37 = vld [vmem:[%s1658_s6 + $0x88] sm:$0xff] }
 0x295   :  { %v1145_v44 = vpack.c.bf16 %v540_v42, %v536_v41  ;;  %v542_v46 = vld [vmem:[#allocation6 + $0x170] sm:$0xff]  ;;  %1176 = vmatprep.subr.bf16.mxu1 %v1175_v43  ;;  %v485_v38 = vld [vmem:[%s1658_s6 + $0xa8] sm:$0xff]  ;;  %v487_v41 = vld [vmem:[%s1658_s6 + $0xb8] sm:$0xff] }
 0x296   :  { %1064 = vmatprep.mubr.msk.f32.mxu0 %vm298_vm5, %v332_v47  ;;  %v1177_v47 = vpack.c.bf16 %v542_v46, %v538_v45  ;;  %v1195_v40 = vpack.c.bf16 %v485_v38, %v481_v37  ;;  %v480_v42 = vld [vmem:[%s1658_s6 + $0x80] sm:$0xff]  ;;  %v482_v46 = vld [vmem:[%s1658_s6 + $0x90] sm:$0xff] }
 0x297   :  { %1065 = vmatmul.mubr.msk.f32.vlgmr.msra.gmra.mrb[2].mxu0 %vm298_vm5, %v333_v48  ;;  %v545_v48 = vld [vmem:[#allocation6 + $0x188] sm:$0xff]  ;;  %v484_v43 = vld [vmem:[%s1658_s6 + $0xa0] sm:$0xff] }
 0x298   :  { %1126 = vmatpush1.bf16.msra.mxu0 %v1125_v49  ;;  %624 = vmatprep.mubr.f32.mxu0 %v1337_v1  ;;  %v549_v49 = vld [vmem:[#allocation6 + $0x1a8] sm:$0xff]  ;;  %v1197_v45 = vpack.c.bf16 %v484_v43, %v480_v42 }
 0x299   :  { %1128 = vmatprep.subr.bf16.mxu0 %v1127_v53  ;;  %v1147_v51 = vpack.c.bf16 %v549_v49, %v545_v48  ;;  %v544_v53 = vld [vmem:[#allocation6 + $0x180] sm:$0xff]  ;;  %1178 = vmatpush1.bf16.msra.mxu1 %v1177_v47  ;;  %v486_v47 = vld [vmem:[%s1658_s6 + $0xb0] sm:$0xff]  ;;  %v489_v49 = vld [vmem:[%s1658_s6 + $0xc8] sm:$0xff] }
 0x29a   :  { %v1149_v56 = vpack.c.bf16 %v548_v54, %v544_v53  ;;  %1180 = vmatprep.subr.bf16.mxu1 %v1179_v55  ;;  %v1213_v48 = vpack.c.bf16 %v486_v47, %v482_v46  ;;  %v1199_v52 = vpack.c.bf16 %v493_v50, %v489_v49  ;;  %v495_v53 = vld [vmem:[%s1658_s6 + $0xf8] sm:$0xff]  ;;  %v488_v54 = vld [vmem:[%s1658_s6 + $0xc0] sm:$0xff]  ;;  %v883_v46 = vsub.s32 1, %v1429_v2 }
 0x29b   :  { %v492_v55 = vld [vmem:[%s1658_s6 + $0xe0] sm:$0xff] }
 0x29c   :  { %1130 = vmatpush1.bf16.msra.mxu0 %v1129_v60  ;;  %v77_v60 = vld [vmem:[%s1655_s3] sm:$0xff]  ;;  %v1201_v58 = vpack.c.bf16 %v492_v55, %v488_v54 }
 0x29d   :  { %1132 = vmatprep.subr.bf16.mxu0 %v1131_v3  ;;  %80 = vst.msk [vmem:[#allocation2] sm:$0xff] %vm79_vm6, %v77_v60  ;;  %v559_v3 = vld [vmem:[#allocation6 + $0x1f8] sm:$0xff]  ;;  %1182 = vmatpush1.bf16.msra.mxu1 %v1181_v59  ;;  %v490_v59 = vld [vmem:[%s1658_s6 + $0xd0] sm:$0xff] }
 0x29e   :  { %v1183_v6 = vpack.c.bf16 %v559_v3, %v555_v63  ;;  %v494_v60 = vld [vmem:[%s1658_s6 + $0xf0] sm:$0xff] }
 0x29f   :  { %v1217_v61 = vpack.c.bf16 %v494_v60, %v490_v59 }
 0x2a0   :  { %1134 = vmatpush1.bf16.msra.mxu0 %v1133_v8  ;;  %v554_v8 = vld [vmem:[#allocation6 + $0x1d0] sm:$0xff]  ;;  %1184 = vmatprep.subr.bf16.mxu1 %v1183_v6 }
 0x2a1   :  { %1136 = vmatprep.subr.bf16.mxu0 %v1135_v16  ;;  %v1185_v10 = vpack.c.bf16 %v558_v9, %v554_v8  ;;  %v464_v16 = vld [vmem:[%s1658_s6] sm:$0xff] }
 0x2a2   :  { %v1189_v19 = vpack.c.bf16 %v468_v17, %v464_v16 }
 0x2a3   :  { %1186 = vmatpush1.bf16.msra.mxu1 %v1185_v10 }
 0x2a4   :  { %1138 = vmatpush1.bf16.msra.mxu0 %v1137_v21  ;;  %v470_v21 = vld [vmem:[%s1658_s6 + $0x30] sm:$0xff]  ;;  %v1542_v22 = vld [vmem:[#allocation2] sm:$0xff]  ;;  %1204 = vmatprep.subr.bf16.mxu1 %v1203_v18 }
 0x2a5   :  { %1140 = vmatprep.subr.bf16.mxu0 %v1139_v27  ;;  %v1205_v23 = vpack.c.bf16 %v470_v21, %v466_v20  ;;  %v1191_v27 = vpack.c.bf16 %v477_v25, %v473_v24 }
 0x2a6   :  { %702 = vmatmul.mubr.f32.vlgmr.msra.gmra.mrb[2].mxu1 %v1542_v22 }
 0x2a7   :  { %1206 = vmatpush1.bf16.msra.mxu1 %v1205_v23  ;;  %707 = vmatprep.mubr.f32.mxu1 %v1337_v1 }
 0x2a8   :  { %1142 = vmatpush1.bf16.msra.mxu0 %v1141_v32  ;;  %v1193_v32 = vpack.c.bf16 %v476_v30, %v472_v29  ;;  %1208 = vmatprep.subr.bf16.mxu1 %v1207_v31 }
 0x2a9   :  { %1144 = vmatprep.subr.bf16.mxu0 %v1143_v39  ;;  %v483_v39 = vld [vmem:[%s1658_s6 + $0x98] sm:$0xff] }
 0x2ab   :  { %1210 = vmatpush1.bf16.msra.mxu1 %v1209_v36  ;;  %v426_v36 = vld [vmem:[#allocation8 + $0x4] ss:$0 sm:$0xff] }
 0x2ac   :  { %1146 = vmatpush1.bf16.msra.mxu0 %v1145_v44  ;;  %v1211_v44 = vpack.c.bf16 %v487_v41, %v483_v39  ;;  %v427_v39 = vld [vmem:[#allocation8 + $0x5] ss:$0 sm:$0xff] }
 0x2ad   :  { %1148 = vmatprep.subr.bf16.mxu0 %v1147_v51  ;;  %v491_v51 = vld [vmem:[%s1658_s6 + $0xd8] sm:$0xff] }
 0x2ae   :  { %1212 = vmatprep.subr.bf16.mxu1 %v1211_v44  ;;  %v1215_v57 = vpack.c.bf16 %v495_v53, %v491_v51  ;;  %v879_v44 = vsub.s32 0, %v1429_v2 }
 0x2af   :  { %1214 = vmatpush1.bf16.msra.mxu1 %v1213_v48 }
 0x2b0   :  { %1150 = vmatpush1.bf16.msra.mxu0 %v1149_v56  ;;  %v1618_v56 = vld [vmem:[#allocation2 + $0x8] sm:$0xff]  ;;  %1216 = vmatprep.subr.bf16.mxu1 %v1215_v57 }
 0x2b1   :  { %1152 = vmatprep.subr.bf16.mxu0 %v1151_v0  ;;  %708 = vmatmul.mubr.f32.gmra.mrb[4].mxu1 %v1618_v56 }
 0x2b2   :  { %861 = vmatprep.mubr.f32.mxu1 %v1337_v1 }
 0x2b3   :  { %1218 = vmatpush1.bf16.msra.mxu1 %v1217_v61 }
 0x2b4   :  { %1154 = vmatpush1.bf16.msra.mxu0 %v1153_v7 }
 0x2b5   :  { %1188 = vmatprep.subr.bf16.mxu0 %v1187_v14 }
 0x2b7   :  { %625 = vmatmul.mubr.f32.vlgmr.msra.gmra.mrb[4].mxu0 %v1542_v22 }
 0x2b8   :  { %1190 = vmatpush1.bf16.msra.mxu0 %v1189_v19  ;;  %630 = vmatprep.mubr.f32.mxu0 %v1337_v1 }
 0x2b9   :  { %1192 = vmatprep.subr.bf16.mxu0 %v1191_v27 }
 0x2bb   :  { %631 = vmatmul.mubr.f32.gmra.mrb[6].mxu0 %v1618_v56 }
 0x2bc   :  { %1194 = vmatpush1.bf16.msra.mxu0 %v1193_v32  ;;  %784 = vmatprep.mubr.f32.mxu0 %v1337_v1 }
 0x2bd   :  { %1196 = vmatprep.subr.bf16.mxu0 %v1195_v40 }
 0x2c0   :  { %1198 = vmatpush1.bf16.msra.mxu0 %v1197_v45  ;;  %v875_v45 = vld [vmem:[#allocation8 + $0x6] ss:$8 sm:$0xf] }
 0x2c1   :  { %1200 = vmatprep.subr.bf16.mxu0 %v1199_v52  ;;  %v880_v47 = vrot.slane %v875_v45, %v879_v44  ;;  %v884_v50 = vrot.slane %v875_v45, %v883_v46 }
 0x2c4   :  { %1202 = vmatpush1.bf16.msra.mxu0 %v1201_v58 }
 0x36a   :  { %v1066_v63 = vpop.f32.mrb[2].mxu0 }
 0x36b   :  { %v421_v0 = vadd.f32 %v1066_v63, %v342_v62  ;;  %v415_v3 = vpop.f32.mrb[3].mxu0 }
 0x36c   :  { %v416_v4 = vadd.f32 %v415_v3, %v342_v62 }
 0x36d   :  { %v425_v5 = vmax.f32 %v421_v0, 0.0 }
 0x36e   :  { %v424_v6 = vmax.f32 %v416_v4, 0.0 }
 0x36f   :  { %v429_v7 = vsel %vm298_vm5, %v425_v5, 0.0  ;;  %v439_v8 = vmul.f32 %v425_v5, %v425_v5 }
 0x370   :  { %v428_v9 = vsel %vm298_vm5, %v424_v6, 0.0  ;;  %v438_v10 = vmul.f32 %v424_v6, %v424_v6 }
 0x371   :  { %v441_v11 = vsel %vm298_vm5, %v439_v8, 0.0  ;;  %v430_v12 = vadd.f32 %v429_v7, %v428_v9  ;;  %v887_v8 = vsub.s32 2, %v1429_v2 }
 0x372   :  { %v440_v13 = vsel %vm298_vm5, %v438_v10, 0.0 }
 0x373   :  { %v431_v14 = vrot.slane %v430_v12, 4  ;;  %v442_v15 = vadd.f32 %v441_v11, %v440_v13 }
 0x375   :  { %v432_v16 = vadd.f32 %v431_v14, %v430_v12  ;;  %v443_v17 = vrot.slane %v442_v15, 4  ;;  %v888_v12 = vrot.slane %v875_v45, %v887_v8 }
 0x377   :  { %v433_v18 = vrot.slane %v432_v16, 2  ;;  %v444_v19 = vadd.f32 %v443_v17, %v442_v15 }
 0x379   :  { %v434_v20 = vadd.f32 %v433_v18, %v432_v16  ;;  %v445_v21 = vrot.slane %v444_v19, 2 }
 0x37b   :  { %v435_v23 = vrot.slane %v434_v20, 1  ;;  %v446_v24 = vadd.f32 %v445_v21, %v444_v19 }
 0x37d   :  { %v436_v25 = vadd.f32 %v435_v23, %v434_v20  ;;  %v447_v26 = vrot.slane %v446_v24, 1 }
 0x37f   :  { %v437_v27 = vmul.f32 0.0625, %v436_v25  ;;  %v448_v28 = vadd.f32 %v447_v26, %v446_v24 }
 0x381   :  { %v449_v29 = vmul.f32 0.0625, %v448_v28  ;;  %v450_v30 = vmul.f32 %v437_v27, %v437_v27  ;;  %v452_v31 = vsub.f32 %v424_v6, %v437_v27  ;;  %v453_v32 = vsub.f32 %v425_v5, %v437_v27 }
 0x382   :  { %v891_v6 = vsub.s32 3, %v1429_v2 }
 0x383   :  { %v451_v33 = vsub.f32 %v449_v29, %v450_v30 }
 0x384   :  { %v892_v10 = vrot.slane %v875_v45, %v891_v6 }
 0x385   :  { %v454_v34 = vadd.f32 1e-05, %v451_v33 }
 0x387   :  { %1238 = vrsqrt.f32 %v454_v34 }
 0x391   :  { %v1239_v35 = vpop.eup %1238 }
 0x392   :  { %v456_v37 = vmul.f32 %v1239_v35, %v452_v31  ;;  %v457_v38 = vmul.f32 %v1239_v35, %v453_v32 }
 0x394   :  { %v458_v40 = vmul.f32 %v456_v37, %v426_v36  ;;  %v459_v42 = vmul.f32 %v457_v38, %v426_v36 }
 0x396   :  { %v460_v41 = vadd.f32 %v458_v40, %v427_v39  ;;  %v461_v43 = vadd.f32 %v459_v42, %v427_v39 }
 0x398   :  { %960 = vmatmul.mubr.msk.f32.vlgmr.msra.gmra.mrb[4].mxu0 %vm298_vm5, %v460_v41  ;;  %962 = vmatmul.mubr.msk.f32.vlgmr.msra.gmra.mrb[2].mxu1 %vm298_vm5, %v460_v41 }
 0x399   :  { %790 = vmatprep.mubr.f32.mxu0 %v1337_v1  ;;  %867 = vmatprep.mubr.f32.mxu1 %v1337_v1 }
 0x39c   :  { %961 = vmatmul.mubr.msk.f32.gmra.mrb[6].mxu0 %vm298_vm5, %v461_v43  ;;  %963 = vmatmul.mubr.msk.f32.gmra.mrb[4].mxu1 %vm298_vm5, %v461_v43 }
 0x46b   :  { %v786_v48 = vpop.f32.mrb[4].mxu0  ;;  %v863_v49 = vpop.f32.mrb[2].mxu1 }
 0x46c   :  { %v897_v51 = vadd.f32 %v880_v47, %v786_v48  ;;  %v788_v52 = vpop.f32.mrb[5].mxu0  ;;  %v865_v53 = vpop.f32.mrb[3].mxu1  ;;  %v899_v17 = vadd.f32 %v888_v12, %v863_v49 }
 0x46d   :  { %v898_v55 = vadd.f32 %v884_v50, %v788_v52  ;;  %v900_v14 = vadd.f32 %v892_v10, %v865_v53 }
 0x46e   :  { %v964_v54 = vmul.f32 -1.442695, %v897_v51 }
 0x46f   :  { %v792_v1 = vpop.f32.mrb[6].mxu0  ;;  %v869_v57 = vpop.f32.mrb[4].mxu1  ;;  %v966_v63 = vmul.f32 -1.442695, %v898_v55 }
 0x470   :  { %1240 = vpow2.f32 %v964_v54  ;;  %v901_v58 = vadd.f32 %v880_v47, %v792_v1  ;;  %v794_v59 = vpop.f32.mrb[7].mxu0  ;;  %v871_v60 = vpop.f32.mrb[5].mxu1  ;;  %v903_v23 = vadd.f32 %v888_v12, %v869_v57 }
 0x471   :  { %v902_v62 = vadd.f32 %v884_v50, %v794_v59  ;;  %v904_v20 = vadd.f32 %v892_v10, %v871_v60 }
 0x472   :  { %v965_v61 = vmul.f32 -1.442695, %v901_v58 }
 0x473   :  { %v967_v0 = vmul.f32 -1.442695, %v902_v62 }
 0x474   :  { %1242 = vpow2.f32 %v965_v61 }
 0x475   :  { %1244 = vpow2.f32 %v966_v63 }
 0x476   :  { %1246 = vpow2.f32 %v967_v0 }
 0x47a   :  { %v1241_v3 = vpop.eup %1240 }
 0x47b   :  { %v911_v4 = vadd.f32 1.0, %v1241_v3 }
 0x47d   :  { %1248 = vrcp.f32 %v911_v4 }
 0x47e   :  { %v1243_v5 = vpop.eup %1242 }
 0x47f   :  { %v912_v7 = vadd.f32 1.0, %v1243_v5  ;;  %v1245_v9 = vpop.eup %1244 }
 0x480   :  { %v1247_v11 = vpop.eup %1246  ;;  %v923_v13 = vadd.f32 1.0, %v1245_v9 }
 0x481   :  { %1250 = vrcp.f32 %v912_v7  ;;  %v924_v16 = vadd.f32 1.0, %v1247_v11 }
 0x482   :  { %1252 = vrcp.f32 %v923_v13 }
 0x483   :  { %1254 = vrcp.f32 %v924_v16 }
 0x487   :  { %v1249_v15 = vpop.eup %1248 }
 0x488   :  { %v929_v18 = vmul.f32 %v1249_v15, %v900_v14 }
 0x48a   :  { %v931_v19 = vadd.f32 %v929_v18, %v899_v17 }
 0x48b   :  { %v1251_v21 = vpop.eup %1250 }
 0x48c   :  { %1256 = vtanh.f32 %v931_v19  ;;  %v930_v24 = vmul.f32 %v1251_v21, %v904_v20  ;;  %v1253_v25 = vpop.eup %1252 }
 0x48d   :  { %v1255_v26 = vpop.eup %1254  ;;  %v935_v27 = vsub.f32 1.0, %v1253_v25  ;;  %v939_v29 = vmul.f32 %v1253_v25, %v1542_v22 }
 0x48e   :  { %v932_v2 = vadd.f32 %v930_v24, %v903_v23  ;;  %v936_v32 = vsub.f32 1.0, %v1255_v26  ;;  %v940_v34 = vmul.f32 %v1255_v26, %v1618_v56 }
 0x490   :  { %1258 = vtanh.f32 %v932_v2 }
 0x496   :  { %v1257_v28 = vpop.eup %1256 }
 0x497   :  { %v937_v30 = vmul.f32 %v1257_v28, %v935_v27 }
 0x499   :  { %v941_v31 = vadd.f32 %v939_v29, %v937_v30 }
 0x49a   :  { %v1259_v33 = vpop.eup %1258 }
 0x49b   :  { %943 = vst [vmem:[#allocation2] sm:$0xff] %v941_v31  ;;  %945 = vst [vmem:[%s1661_s9] sm:$0xff] %v941_v31  ;;  %v938_v35 = vmul.f32 %v1259_v33, %v936_v32 }
 0x49d   :  { %v942_v36 = vadd.f32 %v940_v34, %v938_v35 }
 0x49f   :  { %944 = vst [vmem:[#allocation2 + $0x8] sm:$0xff] %v942_v36  ;;  %946 = vst [vmem:[%s1661_s9 + $0x8] sm:$0xff] %v942_v36 }
 0x4a0   :  { %951 = vsyncpa [#allocation5], 1 }
 0x4a1   :  { %952 = vsyncpa [#allocation7], 1 }

</bundles_post_ra>
